<compile_context>
chip_gen: v5e
topology: v5e:2x2
jax: 0.10.0
libtpu: 0.0.40
codegen_flags: <defaults>
</compile_context>

<pallas_src>
import math
import jax
import jax.numpy as jnp
from jax.experimental import pallas as pl
from jax.experimental.pallas import tpu as pltpu


def _patch_embed_kernel(x_ref, w_ref, b_ref, o_ref):
    # (TILE_B, K) @ (K, N) + (1, N) -> (TILE_B, N), fully in VMEM.
    # precision=HIGHEST for exact f32 parity with the reference (op is
    # bandwidth-bound, the extra MXU passes are free).
    acc = jnp.dot(
        x_ref[...], w_ref[...],
        preferred_element_type=jnp.float32,
        precision=jax.lax.Precision.HIGHEST,
    )
    o_ref[...] = (acc + b_ref[...]).astype(o_ref.dtype)


def _choose_batch_tile(B, tile_b):
    """Pick the batch tile: big (amortize per-step overhead), multiple of 8,
    and guaranteeing >= 2 grid steps for moderate B so both v7x TCs get work."""
    if B <= 8:
        return B                      # single full-extent block (always legal)
    half = max(8, (B // 2) // 8 * 8)  # round_down(B/2, 8), at least one sublane tile
    return min(tile_b, half)


def patch_embeddings_forward(x, weight, bias, *, feature_size, num_patches,
                             embed_dim, tile_b=8192, out_dtype=None):
    """x: (B, feature_size); weight: (patch_size, embed_dim); bias: (embed_dim,)."""
    patch_size = math.ceil(feature_size / num_patches)
    B = x.shape[0]
    K = feature_size
    N = num_patches * embed_dim
    out_dtype = x.dtype if out_dtype is None else out_dtype

    # Build the block-diagonal weight once (tiny: (num_patches*patch_size, N)).
    # W_big[p*patch_size + k, q*embed_dim + e] = (p == q) * weight[k, e]
    eye = jnp.eye(num_patches, dtype=weight.dtype)
    w_big = jnp.einsum("pq,ke->pkqe", eye, weight).reshape(
        num_patches * patch_size, N)
    # Drop rows that would multiply the zero padding -> F.pad is fused away.
    w_eff = w_big[:feature_size, :]                       # (K, N)
    b_big = jnp.tile(bias, num_patches).reshape(1, N)     # (1, N)

    tb = _choose_batch_tile(B, tile_b)
    grid_m = pl.cdiv(B, tb)

    out2d = pl.pallas_call(
        _patch_embed_kernel,
        out_shape=jax.ShapeDtypeStruct((B, N), out_dtype),
        grid_spec=pl.GridSpec(
            grid=(grid_m,),
            in_specs=[
                pl.BlockSpec((tb, K), lambda i: (i, 0)),   # pipelined input tiles
                pl.BlockSpec((K, N), lambda i: (0, 0)),    # weight resident in VMEM
                pl.BlockSpec((1, N), lambda i: (0, 0)),    # bias resident in VMEM
            ],
            out_specs=pl.BlockSpec((tb, N), lambda i: (i, 0)),  # lane-dense (N=256)
        ),
        compiler_params=pltpu.CompilerParams(
            dimension_semantics=("parallel",),   # shard M across TCs on v7x
            vmem_limit_bytes=48 << 20,           # cover v5e's 16 MiB scoped default;
                                                 # < v7x's 64 MiB physical ceiling
        ),
    )(x, w_eff, b_big)

    return out2d.reshape(B, num_patches, embed_dim)


def _reference(x, weight, bias, *, feature_size, num_patches, embed_dim):
    """Plain-JAX reference: same math as F.pad + view + Linear, exact f32."""
    patch_size = math.ceil(feature_size / num_patches)
    pad_size = num_patches * patch_size - feature_size
    B = x.shape[0]
    xp = jnp.pad(x, ((0, 0), (0, pad_size))).reshape(B, num_patches, patch_size)
    return jnp.einsum("bps,se->bpe", xp, weight,
                      precision=jax.lax.Precision.HIGHEST) + bias


if __name__ == "__main__":
    # Module config (small, consistent with the forward pass).
    feature_size = 30
    num_patches = 8
    embed_dim = 32
    patch_size = math.ceil(feature_size / num_patches)        # 4

    key = jax.random.PRNGKey(0)
    kx, kw, kb, kx2 = jax.random.split(key, 4)

    # Deterministic parameter init (nn.Linear-style uniform bound).
    bound = 1.0 / math.sqrt(patch_size)
    weight = jax.random.uniform(kw, (patch_size, embed_dim), jnp.float32, -bound, bound)
    bias = jax.random.uniform(kb, (embed_dim,), jnp.float32, -bound, bound)

    # --- Test 1: small batch (single full-extent block) ---------------------
    batch = 2
    x = jax.random.normal(kx, (batch, feature_size), jnp.float32)
    out = patch_embeddings_forward(
        x, weight, bias,
        feature_size=feature_size, num_patches=num_patches, embed_dim=embed_dim,
    )
    jax.block_until_ready(out)
    ref = _reference(x, weight, bias, feature_size=feature_size,
                     num_patches=num_patches, embed_dim=embed_dim)
    assert out.shape == (batch, num_patches, embed_dim)
    assert jnp.allclose(out, ref, atol=1e-5, rtol=1e-5)

    # --- Test 2: multi-block grid + partial last block (B % tb != 0) --------
    batch2 = 2050
    x2 = jax.random.normal(kx2, (batch2, feature_size), jnp.float32)
    out2 = patch_embeddings_forward(
        x2, weight, bias,
        feature_size=feature_size, num_patches=num_patches, embed_dim=embed_dim,
        tile_b=8192,   # tb is auto-capped to 1024 -> 3 grid steps, last one partial
    )
    jax.block_until_ready(out2)
    ref2 = _reference(x2, weight, bias, feature_size=feature_size,
                      num_patches=num_patches, embed_dim=embed_dim)
    assert out2.shape == (batch2, num_patches, embed_dim)
    assert jnp.allclose(out2, ref2, atol=1e-5, rtol=1e-5)

    print("KERNEL_OK")
</pallas_src>

<mosaic_0001>
module attributes {stable_mosaic.version = 11 : i64} {
  func.func @_patch_embed_kernel(%arg0: i32, %arg1: memref<2x30xf32, #tpu.memory_space<vmem>>, %arg2: memref<30x256xf32, #tpu.memory_space<vmem>>, %arg3: memref<1x256xf32, #tpu.memory_space<vmem>>, %arg4: memref<2x256xf32, #tpu.memory_space<vmem>>) attributes {dimension_semantics = [#tpu.dimension_semantics<parallel>], iteration_bounds = array<i64: 1>, scalar_prefetch = 0 : i64, scratch_operands = 0 : i64, tpu.core_type = #tpu.core_type<tc>, window_params = [{transform_indices = @transform_0, window_bounds = array<i64: 2, 30>}, {pipeline_mode = #tpu.pipeline_mode<synchronous>, transform_indices = @transform_1, window_bounds = array<i64: 30, 256>}, {pipeline_mode = #tpu.pipeline_mode<synchronous>, transform_indices = @transform_2, window_bounds = array<i64: 1, 256>}, {transform_indices = @transform_3, window_bounds = array<i64: 2, 256>}]} {
    %c0 = arith.constant 0 : index
    %c0_0 = arith.constant 0 : index
    %0 = vector.load %arg1[%c0, %c0_0] : memref<2x30xf32, #tpu.memory_space<vmem>>, vector<2x30xf32>
    %c0_1 = arith.constant 0 : index
    %c0_2 = arith.constant 0 : index
    %1 = vector.load %arg2[%c0_1, %c0_2] : memref<30x256xf32, #tpu.memory_space<vmem>>, vector<30x256xf32>
    %cst = arith.constant dense<0.000000e+00> : vector<2x256xf32>
    %2 = tpu.matmul %0, %1, %cst {dimension_numbers = #tpu.dot_dimension_numbers<[1], [0], [0], [1], [0, 0, 1, 1], [], []>, precision = #tpu.contract_precision<fp32>} : vector<2x30xf32>, vector<30x256xf32>, vector<2x256xf32> -> vector<2x256xf32>
    %c0_3 = arith.constant 0 : index
    %c0_4 = arith.constant 0 : index
    %3 = vector.load %arg3[%c0_3, %c0_4] : memref<1x256xf32, #tpu.memory_space<vmem>>, vector<1x256xf32>
    %4 = vector.broadcast %3 : vector<1x256xf32> to vector<2x256xf32>
    %5 = arith.addf %2, %4 : vector<2x256xf32>
    %c0_5 = arith.constant 0 : index
    %c0_6 = arith.constant 0 : index
    %6 = vector.load %arg4[%c0_5, %c0_6] : memref<2x256xf32, #tpu.memory_space<vmem>>, vector<2x256xf32>
    tpu.vector_store %arg4[%c0_5, %c0_6], %5 {strides = array<i32>} : memref<2x256xf32, #tpu.memory_space<vmem>>, vector<2x256xf32>,
    return
  }
  func.func @transform_0(%arg0: i32) -> (i32, i32) {
    %c0_i32 = arith.constant 0 : i32
    %c0_i32_0 = arith.constant 0 : i32
    return %arg0, %c0_i32 : i32, i32
  }
  func.func @transform_1(%arg0: i32) -> (i32, i32) {
    %c0_i32 = arith.constant 0 : i32
    %c0_i32_0 = arith.constant 0 : i32
    %c0_i32_1 = arith.constant 0 : i32
    return %c0_i32, %c0_i32_0 : i32, i32
  }
  func.func @transform_2(%arg0: i32) -> (i32, i32) {
    %c0_i32 = arith.constant 0 : i32
    %c0_i32_0 = arith.constant 0 : i32
    %c0_i32_1 = arith.constant 0 : i32
    return %c0_i32, %c0_i32_0 : i32, i32
  }
  func.func @transform_3(%arg0: i32) -> (i32, i32) {
    %c0_i32 = arith.constant 0 : i32
    %c0_i32_0 = arith.constant 0 : i32
    return %arg0, %c0_i32 : i32, i32
  }
}

</mosaic_0001>

<bundles_post_ra>
// kernel: tpu_custom_call.1
= control target key start
LH: loop header
LB: loop body
LE: loop exit
PB: predicated region body
PF: predicated region fallthrough
CT: control target
= control target key end

     0   :  { %8 = vsyncpa [#allocation3], 0  ;;  %s713_s0 = inlined_call_operand.hbm [shape: f32[2,30], index: 0, kind: input, shape index: {}]   ;;  %s714_s1 = inlined_call_operand.hbm [shape: f32[30,256], index: 1, kind: input, shape index: {}]   ;;  %s715_s2 = inlined_call_operand.hbm [shape: f32[1,256], index: 2, kind: input, shape index: {}]   ;;  %s716_s3 = inlined_call_operand.hbm [shape: f32[2,256], index: 3, kind: output, shape index: {}]  }
   0x1   :  { %9 = vsyncpa [#allocation6], 0  ;;  %s26_s14 = sshll.u32 %s714_s1, 4  ;;  %s27_s14 = int_to_ptr.hbm [resolvable:$true] %s26_s14 }
   0x2   :  { %10 = vsyncpa [#allocation4], 0  ;;  %s587_s15 = smov [#allocation5]   ;;  %s16_s19 = sshll.u32 %s713_s0, 4  ;;  %s17_s19 = int_to_ptr.hbm [resolvable:$true] %s16_s19 }
   0x3   :  { %s28_s16 = sshll.u32 %s587_s15, 4  ;;  %s588_s20 = smov 256   ;;  %s29_s16 = int_to_ptr.vmem [resolvable:$true] %s28_s16 }
   0x4   :  { %s589_s21 = smov 16   ;;  %s590_s22 = smov [#allocation2]  }
   0x5   :  { %34 = dma.hbm_to_vmem [thread:$0]  %s27_s14, 1024, %s29_s16, [#allocation6], %s588_s20, %s588_s20, %s589_s21  }
   0x6   :  { %s18_s23 = sshll.u32 %s590_s22, 4  ;;  %s40_s26 = sshll.u32 %s715_s2, 4  ;;  %s19_s23 = int_to_ptr.vmem [resolvable:$true] %s18_s23  ;;  %s41_s26 = int_to_ptr.hbm [resolvable:$true] %s40_s26 }
   0x7   :  { %21 = dma.hbm_to_vmem [thread:$0]  %s17_s19, 32, %s19_s23, [#allocation3]  }
   0x8   :  { %s591_s1 = smov [#allocation7]  }
   0x9   :  { %s42_s27 = sshll.u32 %s591_s1, 4  ;;  %s43_s27 = int_to_ptr.vmem [resolvable:$true] %s42_s27 }
   0xa   :  { %45 = dma.hbm_to_vmem [thread:$0]  %s41_s26, 32, %s43_s27, [#allocation6]  }
   0xb   :  { %581 = dma.done.wait [#allocation3], 32  }
   0xc   :  { %582 = vsyncadd [#allocation3], 4294967264 }
   0xd   :  { %583 = dma.done.wait [#allocation6], 1056  }
   0xe   :  { %584 = vsyncadd [#allocation6], 4294966240  ;;  %vm77_vm0 = vcmask 1045504   ;;  %v65_v0 = vld [vmem:[#allocation5 + $0x30] sm:$0x3f]  ;;  %v63_v2 = vld [vmem:[#allocation5 + $0x20] sm:$0xff] }
   0xf   :  { %v66_v1 = vld [vmem:[#allocation5 + $0x38] sm:$0x3f]  ;;  %vm73_vm1 = vcmask 244736   ;;  %v79_v3 = vsel %vm77_vm0, %v65_v0, 0  ;;  %v622_v5 = vand.u32 4294901760, %v63_v2  ;;  %v61_v6 = vld [vmem:[#allocation5 + $0x10] sm:$0xff] }
  0x10   :  { %v82_v4 = vsel %vm77_vm0, %v66_v1, 0  ;;  %v59_v7 = vld [vmem:[#allocation5] sm:$0xff]  ;;  %v64_v8 = vld [vmem:[#allocation5 + $0x28] sm:$0xff]  ;;  %v624_v9 = vand.u32 4294901760, %v79_v3  ;;  %v626_v10 = vand.u32 4294901760, %v61_v6  ;;  %v62_v17 = vld [vmem:[#allocation5 + $0x18] sm:$0xff] }
  0x11   :  { %v628_v11 = vand.u32 4294901760, %v59_v7  ;;  %v58_v12 = vld [vmem:[#allocation2] sm:$0x3]  ;;  %v630_v13 = vand.u32 4294901760, %v82_v4  ;;  %v633_v14 = vsub.f32 %v63_v2, %v622_v5  ;;  %v635_v16 = vand.u32 4294901760, %v64_v8  ;;  %v60_v22 = vld [vmem:[#allocation5 + $0x8] sm:$0xff] }
  0x12   :  { %v75_v15 = vsel %vm73_vm1, %v58_v12, 0  ;;  %v126_v18 = vsub.f32 %v79_v3, %v624_v9  ;;  %97 = vmatpush.msra.mxu0 %v624_v9  ;;  %197 = vmatpush.msra.mxu3 %v624_v9  ;;  %v138_v19 = vsub.f32 %v61_v6, %v626_v10  ;;  %v650_v25 = vand.u32 4294901760, %v62_v17  ;;  %v67_v58 = vld [vmem:[#allocation7] sm:$0x3]  ;;  %s592_s0 = smov [#allocation8]   ;;  %s468_s30 = sshll.u32 %s716_s3, 4  ;;  %s469_s30 = int_to_ptr.hbm [resolvable:$true] %s468_s30 }
  0x13   :  { %v642_v20 = vsub.f32 %v59_v7, %v628_v11  ;;  %v644_v21 = vand.u32 4294901760, %v75_v15  ;;  %v133_v23 = vand.u32 4294901760, %v633_v14  ;;  %v648_v24 = vsub.f32 %v82_v4, %v630_v13  ;;  %s466_s2 = sshll.u32 %s592_s0, 4  ;;  %s467_s2 = int_to_ptr.vmem [resolvable:$true] %s466_s2 }
  0x14   :  { %v653_v26 = vsub.f32 %v64_v8, %v635_v16  ;;  %168 = vmatpush.msra.mxu2 %v126_v18  ;;  %99 = vmatpush.msra.mxu0 %v622_v5  ;;  %v127_v27 = vand.u32 4294901760, %v126_v18  ;;  %v139_v29 = vand.u32 4294901760, %v138_v19  ;;  %v664_v34 = vand.u32 4294901760, %v60_v22 }
  0x15   :  { %v657_v28 = vsub.f32 %v75_v15, %v644_v21  ;;  %v145_v30 = vand.u32 4294901760, %v642_v20  ;;  %199 = vmatpush.msra.mxu3 %v622_v5  ;;  %v134_v31 = vsub.f32 %v633_v14, %v133_v23  ;;  %v312_v32 = vand.u32 4294901760, %v648_v24 }
  0x16   :  { %v318_v33 = vand.u32 4294901760, %v653_v26  ;;  %171 = vmatpush.msra.mxu2 %v633_v14  ;;  %v128_v35 = vsub.f32 %v126_v18, %v127_v27  ;;  %101 = vmatpush.msra.mxu0 %v626_v10  ;;  %v140_v36 = vsub.f32 %v138_v19, %v139_v29  ;;  %v323_v40 = vsub.f32 %v62_v17, %v650_v25 }
  0x17   :  { %v669_v37 = vand.u32 4294901760, %v657_v28  ;;  %201 = vmatpush.msra.mxu3 %v626_v10  ;;  %v313_v38 = vsub.f32 %v648_v24, %v312_v32  ;;  %v135_v42 = vand.u32 4294901760, %v134_v31  ;;  %v146_v44 = vsub.f32 %v642_v20, %v145_v30 }
  0x18   :  { %v319_v39 = vsub.f32 %v653_v26, %v318_v33  ;;  %v129_v41 = vand.u32 4294901760, %v128_v35  ;;  %174 = vmatpush.msra.mxu2 %v138_v19  ;;  %103 = vmatpush.msra.mxu0 %v628_v11  ;;  %v324_v46 = vand.u32 4294901760, %v323_v40  ;;  %v329_v47 = vsub.f32 %v60_v22, %v664_v34 }
  0x19   :  { %v107_v43 = vsub.f32 %v657_v28, %v669_v37  ;;  %203 = vmatpush.msra.mxu3 %v628_v11  ;;  %v314_v45 = vand.u32 4294901760, %v313_v38  ;;  %v141_v48 = vand.u32 4294901760, %v140_v36  ;;  %v147_v53 = vand.u32 4294901760, %v146_v44 }
  0x1a   :  { %226 = vmatpush.msrb.mxu0 %v127_v27  ;;  %130 = vmatpush.msra.mxu1 %v129_v41  ;;  %v320_v50 = vand.u32 4294901760, %v319_v39  ;;  %v325_v51 = vsub.f32 %v323_v40, %v324_v46  ;;  %v330_v52 = vand.u32 4294901760, %v329_v47  ;;  %v69_v61 = vperm.slane %v67_v58, 0 }
  0x1b   :  { %177 = vmatpush.msra.mxu2 %v642_v20  ;;  %v108_v49 = vand.u32 4294901760, %v107_v43  ;;  %207 = vmatmul.f32.vlgmr.msra.gmra.mxu3 %v669_v37  ;;  %v70_v1 = vperm.slane %v67_v58, 1  ;;  %vm457_vm2 = vcmask 1041408  }
  0x1c   :  { %180 = vmatmul.f32.vlgmr.msra.gmra.mxu2 %v657_v28  ;;  %136 = vmatpush.msra.mxu1 %v135_v42  ;;  %v331_v54 = vsub.f32 %v329_v47, %v330_v52  ;;  %v326_v55 = vand.u32 4294901760, %v325_v51 }
  0x1d   :  { %282 = vmatpush.msrb.mxu2 %v630_v13  ;;  %109 = vmatmul.f32.vlgmr.msra.gmra.mxu0 %v108_v49 }
  0x1e   :  { %315 = vmatpush.msrb.mxu3 %v314_v45  ;;  %142 = vmatpush.msra.mxu1 %v141_v48  ;;  %v332_v56 = vand.u32 4294901760, %v331_v54 }
  0x1f   :  { %284 = vmatpush.msrb.mxu2 %v635_v16  ;;  %230 = vmatpush.msrb.mxu0 %v133_v23 }
  0x20   :  { %321 = vmatpush.msrb.mxu3 %v320_v50  ;;  %148 = vmatpush.msra.mxu1 %v147_v53 }
  0x21   :  { %286 = vmatpush.msrb.mxu2 %v650_v25  ;;  %150 = vmatmul.f32.vlgmr.msra.gmra.mxu1 %v644_v21 }
  0x22   :  { %234 = vmatpush.msrb.mxu0 %v139_v29  ;;  %257 = vmatpush.msrb.mxu1 %v624_v9 }
  0x23   :  { %288 = vmatpush.msrb.mxu2 %v664_v34  ;;  %327 = vmatpush.msrb.mxu3 %v326_v55 }
  0x24   :  { %238 = vmatpush.msrb.mxu0 %v145_v30  ;;  %259 = vmatpush.msrb.mxu1 %v622_v5 }
  0x25   :  { %294 = vmatmul.f32.vlgmr.msrb.gmra.mxu2 %v108_v49  ;;  %333 = vmatpush.msrb.mxu3 %v332_v56 }
  0x26   :  { %411 = vmatpush.msra.mxu2 %v312_v32  ;;  %261 = vmatpush.msrb.mxu1 %v626_v10 }
  0x27   :  { %240 = vmatmul.f32.vlgmr.msrb.gmra.mxu0 %v644_v21  ;;  %335 = vmatmul.f32.vlgmr.msrb.gmra.mxu3 %v644_v21 }
  0x28   :  { %353 = vmatpush.msra.mxu0 %v648_v24  ;;  %263 = vmatpush.msrb.mxu1 %v628_v11 }
  0x29   :  { %415 = vmatpush.msra.mxu2 %v318_v33  ;;  %442 = vmatpush.msra.mxu3 %v630_v13 }
  0x2a   :  { %265 = vmatmul.f32.vlgmr.msrb.gmra.mxu1 %v644_v21  ;;  %356 = vmatpush.msra.mxu0 %v653_v26 }
  0x2b   :  { %382 = vmatpush.msra.mxu1 %v630_v13  ;;  %419 = vmatpush.msra.mxu2 %v324_v46 }
  0x2c   :  { %444 = vmatpush.msra.mxu3 %v635_v16  ;;  %359 = vmatpush.msra.mxu0 %v323_v40 }
  0x2d   :  { %384 = vmatpush.msra.mxu1 %v635_v16  ;;  %423 = vmatpush.msra.mxu2 %v330_v52 }
  0x2e   :  { %446 = vmatpush.msra.mxu3 %v650_v25  ;;  %362 = vmatpush.msra.mxu0 %v329_v47 }
  0x2f   :  { %386 = vmatpush.msra.mxu1 %v650_v25  ;;  %425 = vmatmul.f32.vlgmr.msra.gmra.mxu2 %v644_v21 }
  0x30   :  { %448 = vmatpush.msra.mxu3 %v664_v34  ;;  %365 = vmatmul.f32.vlgmr.msra.gmra.mxu0 %v657_v28 }
  0x31   :  { %388 = vmatpush.msra.mxu1 %v664_v34  ;;  %450 = vmatmul.f32.vlgmr.msra.gmra.mxu3 %v644_v21 }
  0x32   :  { %392 = vmatmul.f32.vlgmr.msra.gmra.mxu1 %v669_v37 }
  0x9a   :  { %v110_v57 = vpop.f32.mrf.mxu0 }
  0x9b   :  { %v111_v63 = vadd.f32 %v110_v57, %v69_v61 }
  0x9e   :  { %v151_v59 = vpop.f32.mrf.mxu1  ;;  %v208_v62 = vpop.f32.mrf.mxu3 }
  0x9f   :  { %v181_v60 = vpop.f32.mrf.mxu2  ;;  %v152_v3 = vadd.f32 %v151_v59, %v111_v63 }
  0xa1   :  { %v182_v7 = vadd.f32 %v181_v60, %v152_v3 }
  0xa3   :  { %v209_v12 = vadd.f32 %v208_v62, %v182_v7 }
  0xa4   :  { %v241_v0 = vpop.f32.mrf.mxu0 }
  0xa5   :  { %v242_v15 = vadd.f32 %v241_v0, %v209_v12 }
  0xa7   :  { %v266_v2 = vpop.f32.mrf.mxu1 }
  0xa8   :  { %v295_v4 = vpop.f32.mrf.mxu2  ;;  %v267_v19 = vadd.f32 %v266_v2, %v242_v15 }
  0xa9   :  { %v296_v5 = vadd.f32 %v295_v4, %v70_v1 }
  0xaa   :  { %v336_v6 = vpop.f32.mrf.mxu3 }
  0xab   :  { %v337_v8 = vadd.f32 %v336_v6, %v296_v5 }
  0xad   :  { %v366_v9 = vpop.f32.mrf.mxu0 }
  0xae   :  { %v367_v10 = vadd.f32 %v366_v9, %v337_v8 }
  0xaf   :  { %v393_v11 = vpop.f32.mrf.mxu1 }
  0xb0   :  { %v394_v13 = vadd.f32 %v393_v11, %v367_v10 }
  0xb2   :  { %v426_v14 = vpop.f32.mrf.mxu2 }
  0xb3   :  { %v427_v16 = vadd.f32 %v426_v14, %v394_v13 }
  0xb4   :  { %v451_v17 = vpop.f32.mrf.mxu3 }
  0xb5   :  { %v452_v18 = vadd.f32 %v451_v17, %v427_v16 }
  0xb7   :  { %v456_v20 = vrot.slane %v452_v18, 6 }
  0xb9   :  { %v458_v21 = vsel %vm457_vm2, %v267_v19, %v456_v20 }
  0xba   :  { %460 = vst [vmem:[#allocation8] sm:$0xf] %v458_v21 }
  0xbb   :  { %471 = dma.vmem_to_hbm [thread:$0]  %s467_s2, 64, %s469_s30, [#allocation4]  }
  0xbc   :  { %585 = dma.done.wait [#allocation4], 64  }
  0xbd   :  { %586 = vsyncadd [#allocation4], 4294967232 }
  0xbe   :  { %476 = vsyncpa [#allocation3], 1 }
  0xbf   :  { %477 = vsyncpa [#allocation6], 1 }
  0xc0   :  { %478 = vsyncpa [#allocation4], 1 }

</bundles_post_ra>
